<compile_context>
chip_gen: v7x
topology: tpu7x:2x2x1
jax: 0.10.0
libtpu: 0.0.40
codegen_flags: <defaults>
</compile_context>

<pallas_src>
import functools

import jax
import jax.numpy as jnp
from jax.experimental import pallas as pl
from jax.experimental.pallas import tpu as pltpu


def _dice_kernel(x_ref, lbl_ref, inter_ref, psum_ref, cnt_ref,
                 acc_i, acc_p, acc_c, *, masked: bool):
    t = pl.program_id(1)

    @pl.when(t == 0)
    def _():
        acc_i[...] = jnp.zeros_like(acc_i)
        acc_p[...] = jnp.zeros_like(acc_p)
        acc_c[...] = jnp.zeros_like(acc_c)

    x = x_ref[...].astype(jnp.float32)            # (C, T): classes on sublanes, pixels on lanes
    lbl = lbl_ref[...]                            # (1, T) int32; -1 marks padded pixels
    c, tt = x.shape

    # softmax over the class (sublane) axis  ==  log_softmax(x, dim=1).exp()
    m = jnp.max(x, axis=0, keepdims=True)         # (1, T)
    e = jnp.exp(x - m)                            # (C, T)
    inv = 1.0 / jnp.sum(e, axis=0, keepdims=True) # (1, T)
    p = e * inv                                   # (C, T) probabilities

    cls = jax.lax.broadcasted_iota(jnp.int32, (c, tt), 0)
    onehot = (cls == lbl).astype(jnp.float32)     # (C, T); zero for padded (-1) pixels

    if masked:
        p_sum = jnp.where(lbl >= 0, p, 0.0)       # drop padded pixels' prob mass
    else:
        p_sum = p

    # Pure-VPU elementwise accumulation; lane reduction deferred to the last step.
    acc_i[...] += p * onehot                      # intersection partials
    acc_p[...] += p_sum                           # prob-mass partials
    acc_c[...] += onehot                          # per-class pixel counts

    @pl.when(t == pl.num_programs(1) - 1)
    def _():
        inter_ref[...] = jnp.sum(acc_i[...], axis=-1, keepdims=True)
        psum_ref[...] = jnp.sum(acc_p[...], axis=-1, keepdims=True)
        cnt_ref[...] = jnp.sum(acc_c[...], axis=-1, keepdims=True)


def dice_loss(y_pred, y_true, *, smooth: float = 0.1, eps: float = 1e-7,
              tile_hw: int | None = None, block_bytes: int = 1 << 20):
    """Multiclass soft-dice loss. y_pred: [B,C,H,W] logits, y_true: [B,H,W] int."""
    # TODO(synk): binary/multilabel modes, ignore_index lists, and per-class
    #             `weights` rescaling (all disabled by module defaults) not implemented.
    B, C, H, W = y_pred.shape
    HW = H * W

    if tile_hw is None:
        hw_aligned = -(-HW // 128) * 128
        target = max(128, (block_bytes // (4 * C)) // 128 * 128)
        tile_hw = min(target, hw_aligned)
    hw_pad = -(-HW // tile_hw) * tile_hw
    num_tiles = hw_pad // tile_hw

    # Free reshapes: NCHW is already (B, C, HW)-contiguous -> no HBM transpose.
    x = y_pred.reshape(B, C, HW)
    lbl = y_true.reshape(B, 1, HW).astype(jnp.int32)
    if hw_pad != HW:
        x = jnp.pad(x, ((0, 0), (0, 0), (0, hw_pad - HW)))
        lbl = jnp.pad(lbl, ((0, 0), (0, 0), (0, hw_pad - HW)), constant_values=-1)

    kernel = functools.partial(_dice_kernel, masked=(hw_pad != HW))
    out_sds = jax.ShapeDtypeStruct((B, C, 1), jnp.float32)

    inter, psum, cnt = pl.pallas_call(
        kernel,
        out_shape=(out_sds, out_sds, out_sds),
        grid_spec=pltpu.PrefetchScalarGridSpec(
            num_scalar_prefetch=0,
            grid=(B, num_tiles),
            in_specs=[
                pl.BlockSpec((None, C, tile_hw), lambda b, t: (b, 0, t)),
                pl.BlockSpec((None, 1, tile_hw), lambda b, t: (b, 0, t)),
            ],
            out_specs=[
                pl.BlockSpec((None, C, 1), lambda b, t: (b, 0, 0)),
                pl.BlockSpec((None, C, 1), lambda b, t: (b, 0, 0)),
                pl.BlockSpec((None, C, 1), lambda b, t: (b, 0, 0)),
            ],
            scratch_shapes=[
                pltpu.VMEM((C, tile_hw), jnp.float32),
                pltpu.VMEM((C, tile_hw), jnp.float32),
                pltpu.VMEM((C, tile_hw), jnp.float32),
            ],
        ),
        compiler_params=pltpu.CompilerParams(
            dimension_semantics=("parallel", "arbitrary"),
            vmem_limit_bytes=32 * 1024 * 1024),
    )(x, lbl)

    # Tiny per-class epilogue (C elements) in plain JAX.
    intersection = jnp.sum(inter[..., 0], axis=0)     # (C,)  sum over batch partials
    prob_mass = jnp.sum(psum[..., 0], axis=0)         # (C,)
    target_cnt = jnp.sum(cnt[..., 0], axis=0)         # (C,)
    cardinality = prob_mass + target_cnt
    dice = (2.0 * intersection + smooth) / jnp.maximum(cardinality + smooth, eps)
    loss = (1.0 - dice) * (target_cnt > 0).astype(jnp.float32)
    return jnp.mean(loss)                             # weights=None -> mean over classes


def _dice_loss_ref(y_pred, y_true, *, smooth: float = 0.1, eps: float = 1e-7):
    """Pure-JAX mirror of the PyTorch DiceLoss (multiclass, defaults)."""
    B, C, H, W = y_pred.shape
    p = jax.nn.softmax(y_pred.astype(jnp.float32), axis=1).reshape(B, C, -1)
    t = jax.nn.one_hot(y_true.reshape(B, -1), C, dtype=jnp.float32)
    t = jnp.transpose(t, (0, 2, 1))                   # [B, C, HW]
    inter = jnp.sum(p * t, axis=(0, 2))
    card = jnp.sum(p + t, axis=(0, 2))
    dice = (2.0 * inter + smooth) / jnp.maximum(card + smooth, eps)
    loss = (1.0 - dice) * (jnp.sum(t, axis=(0, 2)) > 0).astype(jnp.float32)
    return jnp.mean(loss)


if __name__ == "__main__":
    key = jax.random.PRNGKey(0)
    k1, k2 = jax.random.split(key)

    B, C, H, W = 2, 4, 16, 16
    y_pred = jax.random.normal(k1, (B, C, H, W), dtype=jnp.float32)
    y_true = jax.random.randint(k2, (B, H, W), 0, C, dtype=jnp.int32)

    loss = dice_loss(y_pred, y_true)
    loss = jax.block_until_ready(loss)

    ref = _dice_loss_ref(y_pred, y_true)
    assert jnp.allclose(loss, ref, atol=1e-5, rtol=1e-5), (loss, ref)

    print("KERNEL_OK")
</pallas_src>

<mosaic_0001>
module attributes {stable_mosaic.version = 11 : i64} {
  func.func @_dice_kernel(%arg0: i32, %arg1: i32, %arg2: memref<1x4x256xf32, #tpu.memory_space<vmem>>, %arg3: memref<1x1x256xi32, #tpu.memory_space<vmem>>, %arg4: memref<1x4x1xf32, #tpu.memory_space<vmem>>, %arg5: memref<1x4x1xf32, #tpu.memory_space<vmem>>, %arg6: memref<1x4x1xf32, #tpu.memory_space<vmem>>, %arg7: memref<4x256xf32, #tpu.memory_space<vmem>>, %arg8: memref<4x256xf32, #tpu.memory_space<vmem>>, %arg9: memref<4x256xf32, #tpu.memory_space<vmem>>) attributes {dimension_semantics = [#tpu.dimension_semantics<parallel>, #tpu.dimension_semantics<arbitrary>], iteration_bounds = array<i64: 2, 1>, scalar_prefetch = 0 : i64, scratch_operands = 3 : i64, tpu.core_type = #tpu.core_type<tc>, window_params = [{transform_indices = @transform_0, window_bounds = array<i64: 1, 4, 256>}, {transform_indices = @transform_1, window_bounds = array<i64: 1, 1, 256>}, {transform_indices = @transform_2, window_bounds = array<i64: 1, 4, 1>}, {transform_indices = @transform_3, window_bounds = array<i64: 1, 4, 1>}, {transform_indices = @transform_4, window_bounds = array<i64: 1, 4, 1>}]} {
    %c0_i32 = arith.constant 0 : i32
    %0 = arith.cmpi eq, %arg1, %c0_i32 : i32
    %1 = arith.extui %0 : i1 to i32
    %c0_i32_0 = arith.constant 0 : i32
    %2 = arith.cmpi ne, %1, %c0_i32_0 : i32
    scf.if %2 {
      %cst_22 = arith.constant 0.000000e+00 : f32
      %36 = vector.broadcast %cst_22 : f32 to vector<4x256xf32>
      %c0_23 = arith.constant 0 : index
      %c0_24 = arith.constant 0 : index
      %37 = vector.load %arg7[%c0_23, %c0_24] : memref<4x256xf32, #tpu.memory_space<vmem>>, vector<4x256xf32>
      tpu.vector_store %arg7[%c0_23, %c0_24], %36 {strides = array<i32>} : memref<4x256xf32, #tpu.memory_space<vmem>>, vector<4x256xf32>,
      %cst_25 = arith.constant 0.000000e+00 : f32
      %38 = vector.broadcast %cst_25 : f32 to vector<4x256xf32>
      %c0_26 = arith.constant 0 : index
      %c0_27 = arith.constant 0 : index
      %39 = vector.load %arg8[%c0_26, %c0_27] : memref<4x256xf32, #tpu.memory_space<vmem>>, vector<4x256xf32>
      tpu.vector_store %arg8[%c0_26, %c0_27], %38 {strides = array<i32>} : memref<4x256xf32, #tpu.memory_space<vmem>>, vector<4x256xf32>,
      %cst_28 = arith.constant 0.000000e+00 : f32
      %40 = vector.broadcast %cst_28 : f32 to vector<4x256xf32>
      %c0_29 = arith.constant 0 : index
      %c0_30 = arith.constant 0 : index
      %41 = vector.load %arg9[%c0_29, %c0_30] : memref<4x256xf32, #tpu.memory_space<vmem>>, vector<4x256xf32>
      tpu.vector_store %arg9[%c0_29, %c0_30], %40 {strides = array<i32>} : memref<4x256xf32, #tpu.memory_space<vmem>>, vector<4x256xf32>,
    } else {
    }
    %c0 = arith.constant 0 : index
    %c0_1 = arith.constant 0 : index
    %c0_2 = arith.constant 0 : index
    %3 = vector.load %arg2[%c0, %c0_1, %c0_2] : memref<1x4x256xf32, #tpu.memory_space<vmem>>, vector<1x4x256xf32>
    %4 = vector.shape_cast %3 : vector<1x4x256xf32> to vector<4x256xf32>
    %c0_3 = arith.constant 0 : index
    %c0_4 = arith.constant 0 : index
    %c0_5 = arith.constant 0 : index
    %5 = vector.load %arg3[%c0_3, %c0_4, %c0_5] : memref<1x1x256xi32, #tpu.memory_space<vmem>>, vector<1x1x256xi32>
    %6 = vector.shape_cast %5 : vector<1x1x256xi32> to vector<1x256xi32>
    %cst = arith.constant dense<0xFF800000> : vector<256xf32>
    %7 = vector.multi_reduction <maximumf>, %4, %cst [0] : vector<4x256xf32> to vector<256xf32>
    %8 = vector.shape_cast %7 : vector<256xf32> to vector<1x256xf32>
    %9 = vector.broadcast %8 : vector<1x256xf32> to vector<4x256xf32>
    %10 = arith.subf %4, %9 : vector<4x256xf32>
    %11 = math.exp %10 : vector<4x256xf32>
    %cst_6 = arith.constant dense<0.000000e+00> : vector<256xf32>
    %12 = vector.multi_reduction <add>, %11, %cst_6 [0] : vector<4x256xf32> to vector<256xf32>
    %13 = vector.shape_cast %12 : vector<256xf32> to vector<1x256xf32>
    %cst_7 = arith.constant 1.000000e+00 : f32
    %14 = vector.broadcast %cst_7 : f32 to vector<1x256xf32>
    %15 = arith.divf %14, %13 : vector<1x256xf32>
    %16 = vector.broadcast %15 : vector<1x256xf32> to vector<4x256xf32>
    %17 = arith.mulf %11, %16 : vector<4x256xf32>
    %18 = tpu.iota {dimensions = array<i32: 0>} : vector<4x256xi32>
    %19 = vector.broadcast %6 : vector<1x256xi32> to vector<4x256xi32>
    %20 = arith.cmpi eq, %18, %19 : vector<4x256xi32>
    %21 = arith.extui %20 : vector<4x256xi1> to vector<4x256xi32>
    %22 = arith.sitofp %21 : vector<4x256xi32> to vector<4x256xf32>
    %c0_8 = arith.constant 0 : index
    %c0_9 = arith.constant 0 : index
    %23 = vector.load %arg7[%c0_8, %c0_9] : memref<4x256xf32, #tpu.memory_space<vmem>>, vector<4x256xf32>
    %24 = arith.mulf %17, %22 : vector<4x256xf32>
    %25 = arith.addf %23, %24 : vector<4x256xf32>
    %c0_10 = arith.constant 0 : index
    %c0_11 = arith.constant 0 : index
    %26 = vector.load %arg7[%c0_10, %c0_11] : memref<4x256xf32, #tpu.memory_space<vmem>>, vector<4x256xf32>
    tpu.vector_store %arg7[%c0_10, %c0_11], %25 {strides = array<i32>} : memref<4x256xf32, #tpu.memory_space<vmem>>, vector<4x256xf32>,
    %c0_12 = arith.constant 0 : index
    %c0_13 = arith.constant 0 : index
    %27 = vector.load %arg8[%c0_12, %c0_13] : memref<4x256xf32, #tpu.memory_space<vmem>>, vector<4x256xf32>
    %28 = arith.addf %27, %17 : vector<4x256xf32>
    %c0_14 = arith.constant 0 : index
    %c0_15 = arith.constant 0 : index
    %29 = vector.load %arg8[%c0_14, %c0_15] : memref<4x256xf32, #tpu.memory_space<vmem>>, vector<4x256xf32>
    tpu.vector_store %arg8[%c0_14, %c0_15], %28 {strides = array<i32>} : memref<4x256xf32, #tpu.memory_space<vmem>>, vector<4x256xf32>,
    %c0_16 = arith.constant 0 : index
    %c0_17 = arith.constant 0 : index
    %30 = vector.load %arg9[%c0_16, %c0_17] : memref<4x256xf32, #tpu.memory_space<vmem>>, vector<4x256xf32>
    %31 = arith.addf %30, %22 : vector<4x256xf32>
    %c0_18 = arith.constant 0 : index
    %c0_19 = arith.constant 0 : index
    %32 = vector.load %arg9[%c0_18, %c0_19] : memref<4x256xf32, #tpu.memory_space<vmem>>, vector<4x256xf32>
    tpu.vector_store %arg9[%c0_18, %c0_19], %31 {strides = array<i32>} : memref<4x256xf32, #tpu.memory_space<vmem>>, vector<4x256xf32>,
    %c0_i32_20 = arith.constant 0 : i32
    %33 = arith.cmpi eq, %arg1, %c0_i32_20 : i32
    %34 = arith.extui %33 : i1 to i32
    %c0_i32_21 = arith.constant 0 : i32
    %35 = arith.cmpi ne, %34, %c0_i32_21 : i32
    scf.if %35 {
      %c0_22 = arith.constant 0 : index
      %c0_23 = arith.constant 0 : index
      %36 = vector.load %arg7[%c0_22, %c0_23] : memref<4x256xf32, #tpu.memory_space<vmem>>, vector<4x256xf32>
      %cst_24 = arith.constant dense<0.000000e+00> : vector<4xf32>
      %37 = vector.multi_reduction <add>, %36, %cst_24 [1] : vector<4x256xf32> to vector<4xf32>
      %38 = vector.shape_cast %37 : vector<4xf32> to vector<4x1xf32>
      %c0_25 = arith.constant 0 : index
      %c0_26 = arith.constant 0 : index
      %c0_27 = arith.constant 0 : index
      %39 = vector.load %arg4[%c0_25, %c0_26, %c0_27] : memref<1x4x1xf32, #tpu.memory_space<vmem>>, vector<1x4x1xf32>
      %40 = vector.shape_cast %39 : vector<1x4x1xf32> to vector<4x1xf32>
      %41 = vector.shape_cast %38 : vector<4x1xf32> to vector<1x4x1xf32>
      tpu.vector_store %arg4[%c0_25, %c0_26, %c0_27], %41 {strides = array<i32>} : memref<1x4x1xf32, #tpu.memory_space<vmem>>, vector<1x4x1xf32>,
      %c0_28 = arith.constant 0 : index
      %c0_29 = arith.constant 0 : index
      %42 = vector.load %arg8[%c0_28, %c0_29] : memref<4x256xf32, #tpu.memory_space<vmem>>, vector<4x256xf32>
      %cst_30 = arith.constant dense<0.000000e+00> : vector<4xf32>
      %43 = vector.multi_reduction <add>, %42, %cst_30 [1] : vector<4x256xf32> to vector<4xf32>
      %44 = vector.shape_cast %43 : vector<4xf32> to vector<4x1xf32>
      %c0_31 = arith.constant 0 : index
      %c0_32 = arith.constant 0 : index
      %c0_33 = arith.constant 0 : index
      %45 = vector.load %arg5[%c0_31, %c0_32, %c0_33] : memref<1x4x1xf32, #tpu.memory_space<vmem>>, vector<1x4x1xf32>
      %46 = vector.shape_cast %45 : vector<1x4x1xf32> to vector<4x1xf32>
      %47 = vector.shape_cast %44 : vector<4x1xf32> to vector<1x4x1xf32>
      tpu.vector_store %arg5[%c0_31, %c0_32, %c0_33], %47 {strides = array<i32>} : memref<1x4x1xf32, #tpu.memory_space<vmem>>, vector<1x4x1xf32>,
      %c0_34 = arith.constant 0 : index
      %c0_35 = arith.constant 0 : index
      %48 = vector.load %arg9[%c0_34, %c0_35] : memref<4x256xf32, #tpu.memory_space<vmem>>, vector<4x256xf32>
      %cst_36 = arith.constant dense<0.000000e+00> : vector<4xf32>
      %49 = vector.multi_reduction <add>, %48, %cst_36 [1] : vector<4x256xf32> to vector<4xf32>
      %50 = vector.shape_cast %49 : vector<4xf32> to vector<4x1xf32>
      %c0_37 = arith.constant 0 : index
      %c0_38 = arith.constant 0 : index
      %c0_39 = arith.constant 0 : index
      %51 = vector.load %arg6[%c0_37, %c0_38, %c0_39] : memref<1x4x1xf32, #tpu.memory_space<vmem>>, vector<1x4x1xf32>
      %52 = vector.shape_cast %51 : vector<1x4x1xf32> to vector<4x1xf32>
      %53 = vector.shape_cast %50 : vector<4x1xf32> to vector<1x4x1xf32>
      tpu.vector_store %arg6[%c0_37, %c0_38, %c0_39], %53 {strides = array<i32>} : memref<1x4x1xf32, #tpu.memory_space<vmem>>, vector<1x4x1xf32>,
    } else {
    }
    return
  }
  func.func @transform_0(%arg0: i32, %arg1: i32) -> (i32, i32, i32) {
    %c0_i32 = arith.constant 0 : i32
    %c0_i32_0 = arith.constant 0 : i32
    return %arg0, %c0_i32, %arg1 : i32, i32, i32
  }
  func.func @transform_1(%arg0: i32, %arg1: i32) -> (i32, i32, i32) {
    %c0_i32 = arith.constant 0 : i32
    %c0_i32_0 = arith.constant 0 : i32
    return %arg0, %c0_i32, %arg1 : i32, i32, i32
  }
  func.func @transform_2(%arg0: i32, %arg1: i32) -> (i32, i32, i32) {
    %c0_i32 = arith.constant 0 : i32
    %c0_i32_0 = arith.constant 0 : i32
    %c0_i32_1 = arith.constant 0 : i32
    return %arg0, %c0_i32, %c0_i32_0 : i32, i32, i32
  }
  func.func @transform_3(%arg0: i32, %arg1: i32) -> (i32, i32, i32) {
    %c0_i32 = arith.constant 0 : i32
    %c0_i32_0 = arith.constant 0 : i32
    %c0_i32_1 = arith.constant 0 : i32
    return %arg0, %c0_i32, %c0_i32_0 : i32, i32, i32
  }
  func.func @transform_4(%arg0: i32, %arg1: i32) -> (i32, i32, i32) {
    %c0_i32 = arith.constant 0 : i32
    %c0_i32_0 = arith.constant 0 : i32
    %c0_i32_1 = arith.constant 0 : i32
    return %arg0, %c0_i32, %c0_i32_0 : i32, i32, i32
  }
}

</mosaic_0001>

<bundles_post_ra>
// kernel: tpu_custom_call.1
= control target key start
LH: loop header
LB: loop body
LE: loop exit
PB: predicated region body
PF: predicated region fallthrough
CT: control target
= control target key end

     0   :  { %10 = vsyncpa [#allocation6], 0  ;;  %s1000_s0 = inlined_call_operand.hbm [shape: f32[2,4,256], index: 0, kind: input, shape index: {}]   ;;  %s1001_s1 = inlined_call_operand.hbm [shape: s32[2,1,256], index: 1, kind: input, shape index: {}]   ;;  %s1002_s2 = inlined_call_operand.vmem [shape: f32[2,4,1], index: 2, kind: output, shape index: {0}]   ;;  %s1003_s3 = inlined_call_operand.vmem [shape: f32[2,4,1], index: 3, kind: output, shape index: {1}]   ;;  %s1004_s4 = inlined_call_operand.vmem [shape: f32[2,4,1], index: 4, kind: output, shape index: {2}]  }
   0x1   :  { %12 = vsyncpa [#allocation6 + $0x1], 0 }
   0x2   :  { %13 = vsyncpa [#allocation8], 0 }
   0x3   :  { %15 = vsyncpa [#allocation8 + $0x1], 0  ;;  %s818_s15 = smov 0   ;;  %s820_s16 = smov 0  }
   0x4   :  { %s822_s17 = smov 0   ;;  %s824_s18 = smov 0  }
   0x5   :  { %s826_s19 = smov 0   ;;  %s828_s20 = smov 0  }
   0x6 LB: > { %s583_s21 = sadd.s32 4294967295, %s788_s20   ;;  %s33_s22 = sadd.s32 1, %s784_s19  ;;  %s788_s20 = sphi %s828_s20, %s21_s20   ;;  %s784_s19 = sphi %s826_s19, %s1018_s19   ;;  %s780_s18 = sphi %s824_s18, %s1017_s18   ;;  %s776_s17 = sphi %s822_s17, %s1016_s17   ;;  %s772_s16 = sphi %s820_s16, %s1015_s16   ;;  %s768_s15 = sphi %s818_s15, %s1014_s15  }
   0x7   : > { %p35_p0 = scmp.ge.s32.totalorder %s33_s22, 2  ;;  %s42_s23 = sadd.s32 1, %s776_s17 }
   0x8   : > { %p49_p1 = scmp.ne.s32.totalorder %s776_s17, %s772_s16  ;;  %p50_p2 = scmp.eq.s32.totalorder %s788_s20, 0 }
   0x9   : > { %s1020_s22 = smov (%p35_p0, %s33_s22), 0  ;;  %p55_p4 = scmp.ne.s32.totalorder %s772_s16, %s768_s15 }
   0xa   : > { %p854_p3 = por %p50_p2, %p49_p1  ;;  %s37_s25 = ssub.s32 %s784_s19, %s1020_s22 }
   0xb   : > { %p56_p5 = scmp.eq.s32.totalorder %s583_s21, 0  ;;  %p40_p6 = scmp.eq.s32.totalorder %s37_s25, 0 }
   0xc   : > { %p617_p8 = scmp.lt.s32.totalorder %s788_s20, 2  ;;  %s870_s28 = sand.u32 1, %s776_s17  }
   0xd   : > { %p861_p7 = por %p56_p5, %p55_p4  ;;  %s603_s29 = sshll.u32 %s784_s19, 7 }
   0xe   : > { %s867_s27 = scalar_select %p40_p6, %s776_s17, %s42_s23  }
   0xf   : > { %s1007_s26 = scalar_select %p861_p7, 1, 0 }
  0x10   : > { %s587_s30 = sshll.u32 %s870_s28, 3  ;;  %s877_s7 = scalar_lea.hbm %s1000_s0, %s603_s29 }
  0x11   : > { %s189_s8 = scalar_lea.vmem [#allocation5], %s587_s30  ;;  %p881_p9 = pnand %p617_p8, %p854_p3 }
  0x12   : > { %s199_s9 = sshll.u32 %s189_s8, 4  ;;  %s186_s11 = scalar_lea.sflag [#allocation6], %s870_s28  ;;  %s885_s9 = int_to_ptr.vmem [resolvable:$true] %s199_s9 }
  0x13   : > { %s674_s12 = scalar_lea.hbm %s877_s7, 128  ;;  %p676_p13 = pneg %p881_p9 }
  0x14   : > { %p675_p12 = scmp.ne.s32.totalorder %s877_s7, %s674_s12  ;;  %s679_s15 = scalar_lea.hbm %s1000_s0, 256 }
  0x15   : > { %p680_p2 = scmp.lt.u32.totalorder %s877_s7, %s1000_s0  ;;  %p681_p3 = scmp.lt.u32.totalorder %s679_s15, %s674_s12 }
  0x16   : > { %p677_p0 = pnand %p676_p13, %p675_p12  ;;  %p683_p5 = scmp.lt.u32.totalorder %s674_s12, %s877_s7 }
  0x17   : > { %p682_p4 = por %p681_p3, %p680_p2 }
  0x18   : > { %p678_p1 = pneg %p677_p0 }
  0x19   : > { %p684_p6 = por %p683_p5, %p682_p4 }
  0x1b   : > { %p685_p8 = pnand %p684_p6, %p678_p1 }
  0x1d   : > { %688 = shalt.err (!%p685_p8)
}
  0x1e   : > { %s689_s24 = scalar_lea.vmem %s885_s9, 128  ;;  %s790_s25 = smov [#allocation5]  }
  0x1f   : > { %p690_p12 = scmp.ne.s32.totalorder %s885_s9, %s689_s24  ;;  %s694_s29 = sshll.u32 %s790_s25, 4  ;;  %s695_s29 = int_to_ptr.vmem [resolvable:$false] %s694_s29 }
  0x20   : > { %s696_s30 = scalar_lea.vmem %s695_s29, 256  ;;  %p697_p11 = scmp.lt.s32.totalorder %s885_s9, %s695_s29 }
  0x21   : > { %p692_p0 = pnand %p690_p12, %p676_p13  ;;  %p698_p2 = scmp.lt.s32.totalorder %s696_s30, %s689_s24 }
  0x23   : > { %p693_p10 = pneg %p692_p0  ;;  %p699_p3 = por %p698_p2, %p697_p11 }
  0x25   : > { %p700_p4 = pnand %p699_p3, %p693_p10 }
  0x27   : > { %703 = shalt.err (!%p700_p4)
}
  0x28   : > { %613 = dma.hbm_to_vmem [thread:$0]  (!%p881_p9), %s877_s7, 128, %s885_s9, %s186_s11  }
  0x29   : > { %p1009_p1 = scmp.lt.s32.totalorder %s788_s20, 3  ;;  %p1010_p5 = scmp.ge.s32.totalorder %s788_s20, 1 }
  0x2a   : > { %s590_s6 = sshll.u32 %s870_s28, 1  ;;  %s604_s8 = sshll.u32 %s784_s19, 5 }
  0x2b   : > { %p919_p6 = pnand %p1010_p5, %p1009_p1  ;;  %s928_s14 = scalar_lea.hbm %s1001_s1, %s604_s8 }
  0x2c   : > { %s210_s15 = scalar_lea.vmem [#allocation7], %s590_s6  ;;  %s207_s7 = scalar_lea.sflag [#allocation8], %s870_s28 }
  0x2d   : > { %s1011_s5 = scalar_select %p919_p6, 1, 0 }
  0x2e   : > { %s220_s21 = sshll.u32 %s210_s15, 4  ;;  %s704_s9 = scalar_lea.hbm %s928_s14, 32  ;;  %s221_s21 = int_to_ptr.vmem [resolvable:$true] %s220_s21 }
  0x2f   : > { %p705_p10 = scmp.ne.s32.totalorder %s928_s14, %s704_s9  ;;  %s709_s24 = scalar_lea.hbm %s1001_s1, 64 }
  0x30   : > { %p710_p12 = scmp.lt.u32.totalorder %s928_s14, %s1001_s1  ;;  %p711_p0 = scmp.lt.u32.totalorder %s709_s24, %s704_s9 }
  0x31   : > { %p707_p11 = pnand %p705_p10, %p676_p13  ;;  %p713_p3 = scmp.lt.u32.totalorder %s704_s9, %s928_s14 }
  0x32   : > { %p712_p2 = por %p711_p0, %p710_p12 }
  0x33   : > { %p708_p8 = pneg %p707_p11 }
  0x34   : > { %p714_p4 = por %p713_p3, %p712_p2 }
  0x36   : > { %p715_p1 = pnand %p714_p4, %p708_p8 }
  0x38   : > { %718 = shalt.err (!%p715_p1)
}
  0x39   : > { %s719_s28 = scalar_lea.vmem %s221_s21, 32  ;;  %s791_s30 = smov [#allocation7]  }
  0x3a   : > { %p720_p5 = scmp.ne.s32.totalorder %s221_s21, %s719_s28  ;;  %s724_s6 = sshll.u32 %s791_s30, 4  ;;  %s725_s6 = int_to_ptr.vmem [resolvable:$false] %s724_s6 }
  0x3b   : > { %s726_s8 = scalar_lea.vmem %s725_s6, 64  ;;  %p727_p7 = scmp.lt.s32.totalorder %s221_s21, %s725_s6 }
  0x3c   : > { %p722_p10 = pnand %p720_p5, %p676_p13  ;;  %p728_p6 = scmp.lt.s32.totalorder %s726_s8, %s719_s28 }
  0x3e   : > { %p723_p11 = pneg %p722_p10  ;;  %p729_p0 = por %p728_p6, %p727_p7 }
  0x40   : > { %p730_p12 = pnand %p729_p0, %p723_p11 }
  0x42   : > { %733 = shalt.err (!%p730_p12)
}
  0x43   : > { %616 = dma.hbm_to_vmem [thread:$0]  (!%p881_p9), %s928_s14, 32, %s221_s21, %s207_s7  }
  0x44   : > { %p1012_p8 = scmp.ne.s32.totalorder %s1011_s5, 0 }
  0x45   : > { %s231_s12 = sand.u32 (!%p1012_p8), 1, %s772_s16   ;;  %p1013_p13 = scmp.ne.s32.totalorder (!%p1012_p8), %s1007_s26, 0 }
  0x46   : > { %229 = sbr.rel (%p1012_p8) target bundleno = 298 (0x12a), region = 28  ;;  %s594_s13 = sshll.u32 (!%p1012_p8), %s231_s12, 3 }
  0x47   : > { %s232_s15 = scalar_lea.sflag (!%p1012_p8), [#allocation6], %s231_s12  ;;  %s235_s9 = scalar_lea.vmem (!%p1012_p8), [#allocation5], %s594_s13 }
  0x4d   : > { %759 = dma.done.wait (%p1013_p13), %s232_s15, 128  }
  0x4e   : > { %761 = vsyncadd (%p1013_p13), %s232_s15, 4294967168  ;;  %s595_s11 = sshll.u32 %s231_s12, 1  ;;  %s241_s23 = scalar_lea.sflag [#allocation8], %s231_s12 }
  0x4f   : > { %s244_s10 = scalar_lea.vmem [#allocation7], %s595_s11 }
  0x50   : > { %763 = dma.done.wait (%p1013_p13), %s241_s23, 32  }
  0x51   : > { %765 = vsyncadd (%p1013_p13), %s241_s23, 4294967264  ;;  %v355_v0 = vlaneseq  ;;  %vm307_vm0 = vcmask 1043456   ;;  %v302_v4 = vld [vmem:[%s235_s9] sm:$0xff]  ;;  %v303_v5 = vld [vmem:[%s244_s10] sm:$0x3]  ;;  %v792_v14 = vmov 0.0  }
  0x52   : > { %v305_v6 = vcombine.high %v302_v4, %v302_v4  ;;  %v308_v7 = vsel %vm307_vm0, %v302_v4, -inf  ;;  %p283_p7 = scmp.lt.s32.totalorder %s780_s18, 1  ;;  %vm397_vm3 = vcmask 3072  }
  0x53   : > { %v356_v1 = vshrl.u32 %v355_v0, 7  ;;  %v309_v10 = vrot.slane %v308_v7, 4 }
  0x54   : > { %v315_v11 = vsel %vm307_vm0, %v305_v6, -inf  ;;  %s1022_s18 = smov (!%p283_p7, %s780_s18), 1 }
  0x55   : > { %v359_v2 = vsub.s32 0, %v356_v1  ;;  %v363_v3 = vsub.s32 1, %v356_v1  ;;  %v310_v12 = vmax.f32 %v308_v7, %v309_v10  ;;  %v316_v13 = vrot.slane %v315_v11, 4  ;;  %s596_s26 = sshll.u32 %s1022_s18, 2 }
  0x56   : > { %s294_s21 = scalar_lea.vmem %s1004_s4, %s596_s26  ;;  %s286_s25 = scalar_lea.vmem %s1002_s2, %s596_s26 }
  0x57   : > { %v360_v8 = vrot.slane %v303_v5, %v359_v2  ;;  %v364_v9 = vrot.slane %v303_v5, %v363_v3  ;;  %v311_v19 = vrot.slane %v310_v12, 2  ;;  %v317_v20 = vmax.f32 %v315_v11, %v316_v13  ;;  %s290_s30 = scalar_lea.vmem %s1003_s3, %s596_s26 }
  0x59   : > { %vm365_vm1 = vcmp.eq.s32.totalorder %v356_v1, %v360_v8  ;;  %vm366_vm2 = vcmp.eq.s32.totalorder %v356_v1, %v364_v9  ;;  %v312_v23 = vmax.f32 %v310_v12, %v311_v19  ;;  %v318_v24 = vrot.slane %v317_v20, 2 }
  0x5a   : > { %v599_v15 = vsel %vm365_vm1, 1.0, %v792_v14  ;;  %v600_v16 = vsel %vm366_vm2, 1.0, %v792_v14 }
  0x5b   : > { %v374_v17 = vcombine.low %v599_v15, %v600_v16  ;;  %v605_v18 = vcombine.low %v600_v16, %v600_v16  ;;  %v313_v26 = vrot.slane %v312_v23, 1  ;;  %v319_v27 = vmax.f32 %v317_v20, %v318_v24 }
  0x5d   : > { %v413_v21 = vsel %vm307_vm0, %v374_v17, 0.0  ;;  %v414_v22 = vsel %vm307_vm0, %v605_v18, 0.0  ;;  %v314_v28 = vmax.f32 %v312_v23, %v313_v26  ;;  %v320_v29 = vrot.slane %v319_v27, 1 }
  0x5e   : > { %v415_v25 = vadd.f32 %v414_v22, %v413_v21 }
  0x5f   : > { %v321_v30 = vmax.f32 %v319_v27, %v320_v29 }
  0x60   : > { %416 = vadd.xlane.f32.xlu1 %v415_v25 }
  0x61   : > { %v324_v31 = vcombine.low %v314_v28, %v321_v30 }
  0x63   : > { %v326_v32 = vsub.f32 %v302_v4, %v324_v31 }
  0x65   : > { %v327_v33 = vmul.f32 1.442695, %v326_v32 }
  0x67   : > { %668 = vpow2.f32 %v327_v33 }
  0x71   : > { %v669_v34 = vpop.eup %668 }
  0x72   : > { %v330_v35 = vcombine.high %v669_v34, %v669_v34  ;;  %v332_v36 = vsel %vm307_vm0, %v669_v34, 0.0 }
  0x73   : > { %v333_v37 = vrot.slane %v332_v36, 4 }
  0x74   : > { %v339_v38 = vsel %vm307_vm0, %v330_v35, 0.0 }
  0x75   : > { %v334_v39 = vadd.f32 %v333_v37, %v332_v36  ;;  %v340_v40 = vrot.slane %v339_v38, 4 }
  0x77   : > { %v335_v41 = vrot.slane %v334_v39, 2  ;;  %v341_v42 = vadd.f32 %v340_v40, %v339_v38 }
  0x79   : > { %v336_v43 = vadd.f32 %v335_v41, %v334_v39  ;;  %v342_v44 = vrot.slane %v341_v42, 2 }
  0x7b   : > { %v337_v45 = vrot.slane %v336_v43, 1  ;;  %v343_v46 = vadd.f32 %v342_v44, %v341_v42 }
  0x7d   : > { %v338_v47 = vadd.f32 %v337_v45, %v336_v43  ;;  %v344_v48 = vrot.slane %v343_v46, 1 }
  0x7f   : > { %v345_v49 = vadd.f32 %v344_v48, %v343_v46  ;;  %670 = vrcp.f32 %v338_v47 }
  0x81   : > { %672 = vrcp.f32 %v345_v49 }
  0x89   : > { %v671_v50 = vpop.eup %670 }
  0x8b   : > { %v673_v51 = vpop.eup %672 }
  0x8c   : > { %v352_v52 = vcombine.low %v671_v50, %v673_v51 }
  0x8e   : > { %v354_v53 = vmul.f32 %v669_v34, %v352_v52 }
  0x90   : > { %v376_v54 = vmul.f32 %v374_v17, %v354_v53  ;;  %v401_v55 = vcombine.high %v354_v53, %v354_v53  ;;  %v403_v59 = vsel %vm307_vm0, %v354_v53, 0.0 }
  0x92   : > { %v390_v56 = vcombine.high %v376_v54, %v376_v54  ;;  %v392_v57 = vsel %vm307_vm0, %v376_v54, 0.0  ;;  %v404_v60 = vsel %vm307_vm0, %v401_v55, 0.0 }
  0x93   : > { %v405_v62 = vadd.f32 %v404_v60, %v403_v59 }
  0x94   : > { %v393_v58 = vsel %vm307_vm0, %v390_v56, 0.0 }
  0x95   : > { %v394_v61 = vadd.f32 %v393_v58, %v392_v57 }
  0x97   : > { %395 = vadd.xlane.f32.xlu0 %v394_v61 }
  0x9b   : > { %406 = vadd.xlane.f32.xlu0 %v405_v62 }
  0xed   : > { %v417_v63 = vpop.xlane.xlu1 %416 }
  0xee   : > { %418 = vst.msk [vmem:[%s294_s21] sm:$0xf] %vm397_vm3, %v417_v63 }
 0x124   : > { %v396_v0 = vpop.xlane.xlu0 %395 }
 0x125   : > { %398 = vst.msk [vmem:[%s286_s25] sm:$0xf] %vm397_vm3, %v396_v0 }
 0x128   : > { %v407_v1 = vpop.xlane.xlu0 %406 }
 0x129   : > { %408 = vst.msk [vmem:[%s290_s30] sm:$0xf] %vm397_vm3, %v407_v1 }
 0x12a PF: > { %s21_s20 = sadd.s32 1, %s788_s20   ;;  %s1014_s15 = smov %s772_s16 }
 0x12b   : > { %p18_p9 = scmp.ge.s32.totalorder %s21_s20, 4   ;;  %s1015_s16 = smov %s776_s17 }
 0x12c   : > { %s1016_s17 = smov %s867_s27  ;;  %s1017_s18 = smov %s784_s19 }
 0x12d   : > { %s1018_s19 = smov %s1020_s22  ;;  %20 = sbr.rel (!%p18_p9) target bundleno = 6 (0x6), region = 113 }
 0x134   :  { %466 = vsyncpa [#allocation6], 1 }
 0x135   :  { %468 = vsyncpa [#allocation6 + $0x1], 1 }
 0x136   :  { %469 = vsyncpa [#allocation8], 1 }
 0x137   :  { %471 = vsyncpa [#allocation8 + $0x1], 1 }

</bundles_post_ra>
